<compile_context>
chip_gen: v6e
topology: v6e:2x2x1
jax: 0.10.0
libtpu: 0.0.40
codegen_flags: <defaults>
</compile_context>

<pallas_src>
from functools import partial

import jax
import jax.numpy as jnp
from jax.experimental import pallas as pl
from jax.experimental.pallas import tpu as pltpu


def block_kernel(x_ref, wcat_ref, b1_ref, mw_ref, b2_ref, w3_ref, b3_ref, o_ref,
                 *, kernel_size, width, expand):
    B = x_ref.shape[0]
    HW = x_ref.shape[2]
    E = expand
    k = kernel_size
    p = k // 2
    W = width

    wcat = wcat_ref[...]            # (E+O, C) bf16, BN scales folded in
    w3 = w3_ref[...]                # (O, E)   bf16, BN scale folded in
    b1 = b1_ref[...]                # (E, 1) f32
    b2 = b2_ref[...]                # (E, 1) f32
    b3 = b3_ref[...]                # (O, 1) f32  (pointwise + shortcut BN bias)

    # Static loop over the images of this block: weights are loaded once per grid
    # step and reused; per-image bodies are independent so the LLO scheduler can
    # interleave them. B is capped small in the wrapper to avoid code bloat.
    for b in range(B):
        xm = x_ref[b].astype(jnp.bfloat16)                  # (C, HW), lane-dense

        # --- expand 1x1 conv + shortcut 1x1 conv fused into one MXU matmul ---
        hcat = jnp.dot(wcat, xm, preferred_element_type=jnp.float32)  # (E+O, HW)
        h = jnp.maximum(hcat[:E, :] + b1, 0.0)              # expand + BN bias + ReLU
        sc = hcat[E:, :]                                    # shortcut (bias lives in b3)

        # --- depthwise kxk, stride 1, 'same' padding: lane rolls (XLU slot) with
        # the per-tap border mask already folded into the tap weights ---
        taps = []
        for di in range(k):
            for dj in range(k):
                t = di * k + dj
                s = (di - p) * W + (dj - p)                 # flat pixel shift for this tap
                shifted = h if s == 0 else pltpu.roll(h, (-s) % HW, axis=1)
                taps.append(shifted * mw_ref[t])            # one mul per tap (mask folded)
        # two independent accumulation chains -> shorter dependency chain / more ILP
        acc0 = taps[0]
        acc1 = taps[1]
        for i in range(2, k * k, 2):
            acc0 = acc0 + taps[i]
        for i in range(3, k * k, 2):
            acc1 = acc1 + taps[i]
        h2 = jnp.maximum(acc0 + acc1 + b2, 0.0)

        # TODO(synk): semodule is None in this Block config; an SE block would add
        # a per-channel spatial mean (lane reduction) + two tiny matmuls here.

        # --- pointwise 1x1 conv (BN scale folded into w3) + biases + shortcut ---
        out = jnp.dot(w3, h2.astype(jnp.bfloat16),
                      preferred_element_type=jnp.float32)   # (O, HW)
        o_ref[b] = (out + b3 + sc).astype(o_ref.dtype)       # lane-dense store


def _border_masks(H, W, k):
    """Per-tap validity masks for the flattened (row-major) pixel axis."""
    p = k // 2
    ii, jj = jnp.meshgrid(jnp.arange(H), jnp.arange(W), indexing="ij")
    masks = []
    for di in range(-p, p + 1):
        for dj in range(-p, p + 1):
            valid = (ii + di >= 0) & (ii + di < H) & (jj + dj >= 0) & (jj + dj < W)
            masks.append(valid.reshape(1, H * W).astype(jnp.float32))
    return jnp.stack(masks, axis=0)                         # (k*k, 1, H*W)


def _prepare_params(params, H, W, kernel_size):
    """Host-side folding: eval-mode BN scales into conv weights, expand+shortcut
    merged into one weight, border masks folded into the depthwise taps."""
    w1, s1, b1, dw, s2, b2, w3, s3, b3, ws, ss, bs = params
    E = w1.shape[1]
    O = w3.shape[1]
    k = dw.shape[0]
    # fused expand + shortcut weight, bf16 for a single MXU pass
    wcat = jnp.concatenate([w1 * s1[0], ws * ss[0]], axis=1).T.astype(jnp.bfloat16)  # (E+O, C)
    b1c = b1[0].reshape(E, 1)
    # Fold BN scale + spatial border mask into the depthwise taps: (k*k, E, H*W).
    # NOTE: for large E*H*W (real MobileNet stages) gate this prefolding on size
    # vs. VMEM and keep the (1, H*W) mask separate instead.
    masks = _border_masks(H, W, k)                          # (k*k, 1, H*W)
    mw = (dw * s2[0]).reshape(k * k, E, 1) * masks          # (k*k, E, H*W) f32
    b2c = b2[0].reshape(E, 1)
    w3T = (w3 * s3[0]).T.astype(jnp.bfloat16)               # (O, E)
    b3c = (b3[0] + bs[0]).reshape(O, 1)                     # pointwise + shortcut bias
    return wcat, b1c, mw, b2c, w3T, b3c


def mobile_block(x, params, *, kernel_size):
    """x: (N, C, H, W) NCHW float32 (PyTorch layout). Returns (N, out_size, H, W)."""
    N, C, H, W = x.shape
    HW = H * W
    wcat, b1c, mw, b2c, w3T, b3c = _prepare_params(params, H, W, kernel_size)
    E = b1c.shape[0]
    O = w3T.shape[0]

    # Layout guards: sublane-aligned channel counts, lane-dense pixel axis.
    assert E % 8 == 0 and O % 8 == 0, "expand/out channels must be multiples of 8"
    assert HW % 128 == 0, "H*W must be a multiple of 128"

    # NCHW -> (N, C, H*W) is a free reshape (no HBM transpose round trip).
    xf = x.reshape(N, C, HW)

    # Images per grid step: amortize per-step overhead, keep >= 2 grid steps for
    # v7x's two TensorCores, stay well under the default scoped-VMEM budgets
    # (16 MiB v5e / 32 MiB v6e,v7x) with double-buffered in/out blocks, and cap
    # the in-kernel unroll so code size / live ranges stay bounded.
    vmem_budget = 12 << 20
    per_img = (C + O) * HW * 4 * 2                          # in + out blocks, 2x buffered
    B = int(max(1, min(pl.cdiv(N, 2), 8, vmem_budget // per_img)))
    NB = int(pl.cdiv(N, B))
    Np = NB * B
    if Np != N:
        xf = jnp.concatenate([xf, jnp.zeros((Np - N, C, HW), xf.dtype)], axis=0)

    def full_spec(a):
        nd = a.ndim
        return pl.BlockSpec(a.shape, lambda n, _nd=nd: (0,) * _nd)

    flops = 2 * Np * HW * (C * (E + O) + kernel_size * kernel_size * E + E * O)
    bytes_accessed = int(Np * (C + O) * HW * 4 + wcat.size * 2 + w3T.size * 2
                         + mw.size * 4)

    kernel = partial(block_kernel, kernel_size=kernel_size, width=W, expand=E)
    out = pl.pallas_call(
        kernel,
        out_shape=jax.ShapeDtypeStruct((Np, O, HW), x.dtype),
        grid=(NB,),
        in_specs=[pl.BlockSpec((B, C, HW), lambda n: (n, 0, 0))]
                 + [full_spec(a) for a in (wcat, b1c, mw, b2c, w3T, b3c)],
        out_specs=pl.BlockSpec((B, O, HW), lambda n: (n, 0, 0)),
        compiler_params=pltpu.CompilerParams(dimension_semantics=("parallel",)),
        cost_estimate=pl.CostEstimate(flops=flops, transcendentals=0,
                                      bytes_accessed=bytes_accessed),
    )(xf, wcat, b1c, mw, b2c, w3T, b3c)
    return out[:N].reshape(N, O, H, W)


def fold_bn(gamma, beta, mean, var, eps=1e-5):
    scale = gamma / jnp.sqrt(var + eps)
    bias = beta - mean * scale
    return scale.reshape(1, -1), bias.reshape(1, -1)


def make_params(key, in_size, expand_size, out_size, kernel_size):
    ks = jax.random.split(key, 16)

    def bn_params(k0, k1, k2, k3, ch):
        gamma = jax.random.uniform(k0, (ch,), jnp.float32, 0.5, 1.5)
        beta = 0.1 * jax.random.normal(k1, (ch,), jnp.float32)
        mean = 0.1 * jax.random.normal(k2, (ch,), jnp.float32)
        var = jax.random.uniform(k3, (ch,), jnp.float32, 0.5, 1.5)
        return fold_bn(gamma, beta, mean, var)

    w1 = 0.2 * jax.random.normal(ks[0], (in_size, expand_size), jnp.float32)
    s1, b1 = bn_params(ks[1], ks[2], ks[3], ks[4], expand_size)
    dw = 0.2 * jax.random.normal(ks[5], (kernel_size, kernel_size, expand_size),
                                 jnp.float32)
    s2, b2 = bn_params(ks[6], ks[7], ks[8], ks[9], expand_size)
    w3 = 0.2 * jax.random.normal(ks[10], (expand_size, out_size), jnp.float32)
    s3, b3 = bn_params(ks[11], ks[12], ks[13], ks[14], out_size)
    ws = 0.2 * jax.random.normal(ks[15], (in_size, out_size), jnp.float32)
    ss, bs = fold_bn(jnp.linspace(0.8, 1.2, out_size),
                     jnp.linspace(-0.1, 0.1, out_size),
                     jnp.linspace(-0.05, 0.05, out_size),
                     jnp.linspace(0.9, 1.1, out_size))
    return (w1, s1, b1, dw, s2, b2, w3, s3, b3, ws, ss, bs)


def reference(x, params, kernel_size):
    """Pure-JAX reference of the same forward (NCHW in / NCHW out)."""
    w1, s1, b1, dw, s2, b2, w3, s3, b3, ws, ss, bs = params
    k = kernel_size
    p = k // 2
    xh = jnp.transpose(x, (0, 2, 3, 1))                     # NHWC
    N, H, W, _ = xh.shape
    h = jnp.maximum(jnp.einsum('nhwc,ce->nhwe', xh, w1) * s1[0] + b1[0], 0.0)
    hp = jnp.pad(h, ((0, 0), (p, p), (p, p), (0, 0)))
    acc = jnp.zeros_like(h)
    for di in range(k):
        for dj in range(k):
            acc = acc + hp[:, di:di + H, dj:dj + W, :] * dw[di, dj]
    h2 = jnp.maximum(acc * s2[0] + b2[0], 0.0)
    out = jnp.einsum('nhwe,eo->nhwo', h2, w3) * s3[0] + b3[0]
    sc = jnp.einsum('nhwc,co->nhwo', xh, ws) * ss[0] + bs[0]
    return jnp.transpose(out + sc, (0, 3, 1, 2))


if __name__ == "__main__":
    # Block(kernel_size=3, in_size=4, expand_size=16, out_size=8,
    #       nolinear=ReLU, semodule=None, stride=1), eval-mode BN.
    N, H, W = 4, 16, 16
    in_size, expand_size, out_size, kernel_size = 4, 16, 8, 3

    key = jax.random.PRNGKey(0)
    kx, kp = jax.random.split(key)
    x = jax.random.normal(kx, (N, in_size, H, W), jnp.float32)   # NCHW
    params = make_params(kp, in_size, expand_size, out_size, kernel_size)

    out = mobile_block(x, params, kernel_size=kernel_size)
    out = jax.block_until_ready(out)

    ref = reference(x, params, kernel_size)
    assert out.shape == (N, out_size, H, W)
    # Tolerance: the MXU matmuls use explicit bf16 operands (f32 accumulation),
    # and BN folding into the weights (host side) changes rounding vs. the
    # unfolded reference.
    err = jnp.max(jnp.abs(out - ref))
    assert jnp.allclose(out, ref, rtol=2e-2, atol=2e-2), f"max abs err = {err}"

    print("KERNEL_OK")
</pallas_src>

<mosaic_0001>
module attributes {stable_mosaic.version = 11 : i64} {
  func.func @block_kernel(%arg0: i32, %arg1: memref<2x4x256xf32, #tpu.memory_space<vmem>>, %arg2: memref<24x4xbf16, #tpu.memory_space<vmem>>, %arg3: memref<16x1xf32, #tpu.memory_space<vmem>>, %arg4: memref<9x16x256xf32, #tpu.memory_space<vmem>>, %arg5: memref<16x1xf32, #tpu.memory_space<vmem>>, %arg6: memref<8x16xbf16, #tpu.memory_space<vmem>>, %arg7: memref<8x1xf32, #tpu.memory_space<vmem>>, %arg8: memref<2x8x256xf32, #tpu.memory_space<vmem>>) attributes {dimension_semantics = [#tpu.dimension_semantics<parallel>], iteration_bounds = array<i64: 2>, scalar_prefetch = 0 : i64, scratch_operands = 0 : i64, tpu.core_type = #tpu.core_type<tc>, window_params = [{transform_indices = @transform_0, window_bounds = array<i64: 2, 4, 256>}, {pipeline_mode = #tpu.pipeline_mode<synchronous>, transform_indices = @transform_1, window_bounds = array<i64: 24, 4>}, {pipeline_mode = #tpu.pipeline_mode<synchronous>, transform_indices = @transform_2, window_bounds = array<i64: 16, 1>}, {pipeline_mode = #tpu.pipeline_mode<synchronous>, transform_indices = @transform_3, window_bounds = array<i64: 9, 16, 256>}, {pipeline_mode = #tpu.pipeline_mode<synchronous>, transform_indices = @transform_4, window_bounds = array<i64: 16, 1>}, {pipeline_mode = #tpu.pipeline_mode<synchronous>, transform_indices = @transform_5, window_bounds = array<i64: 8, 16>}, {pipeline_mode = #tpu.pipeline_mode<synchronous>, transform_indices = @transform_6, window_bounds = array<i64: 8, 1>}, {transform_indices = @transform_7, window_bounds = array<i64: 2, 8, 256>}]} {
    %c0 = arith.constant 0 : index
    %c0_0 = arith.constant 0 : index
    %0 = vector.load %arg2[%c0, %c0_0] : memref<24x4xbf16, #tpu.memory_space<vmem>>, vector<24x4xbf16>
    %c0_1 = arith.constant 0 : index
    %c0_2 = arith.constant 0 : index
    %1 = vector.load %arg6[%c0_1, %c0_2] : memref<8x16xbf16, #tpu.memory_space<vmem>>, vector<8x16xbf16>
    %c0_3 = arith.constant 0 : index
    %c0_4 = arith.constant 0 : index
    %2 = vector.load %arg3[%c0_3, %c0_4] : memref<16x1xf32, #tpu.memory_space<vmem>>, vector<16x1xf32>
    %c0_5 = arith.constant 0 : index
    %c0_6 = arith.constant 0 : index
    %3 = vector.load %arg5[%c0_5, %c0_6] : memref<16x1xf32, #tpu.memory_space<vmem>>, vector<16x1xf32>
    %c0_7 = arith.constant 0 : index
    %c0_8 = arith.constant 0 : index
    %4 = vector.load %arg7[%c0_7, %c0_8] : memref<8x1xf32, #tpu.memory_space<vmem>>, vector<8x1xf32>
    %c0_9 = arith.constant 0 : index
    %c0_10 = arith.constant 0 : index
    %c0_11 = arith.constant 0 : index
    %5 = vector.load %arg1[%c0_9, %c0_10, %c0_11] : memref<2x4x256xf32, #tpu.memory_space<vmem>>, vector<1x4x256xf32>
    %6 = vector.shape_cast %5 : vector<1x4x256xf32> to vector<4x256xf32>
    %7 = arith.truncf %6 : vector<4x256xf32> to vector<4x256xbf16>
    %cst = arith.constant dense<0.000000e+00> : vector<24x256xf32>
    %8 = tpu.matmul %0, %7, %cst {dimension_numbers = #tpu.dot_dimension_numbers<[1], [0], [0], [1], [0, 0, 1, 1], [], []>} : vector<24x4xbf16>, vector<4x256xbf16>, vector<24x256xf32> -> vector<24x256xf32>
    %9 = vector.extract_strided_slice %8 {offsets = [0, 0], sizes = [16, 256], strides = [1, 1]} : vector<24x256xf32> to vector<16x256xf32>
    %10 = vector.broadcast %2 : vector<16x1xf32> to vector<16x256xf32>
    %11 = arith.addf %9, %10 : vector<16x256xf32>
    %cst_12 = arith.constant 0.000000e+00 : f32
    %12 = vector.broadcast %cst_12 : f32 to vector<16x256xf32>
    %13 = arith.maximumf %11, %12 : vector<16x256xf32>
    %14 = vector.extract_strided_slice %8 {offsets = [16, 0], sizes = [8, 256], strides = [1, 1]} : vector<24x256xf32> to vector<8x256xf32>
    %c17_i32 = arith.constant 17 : i32
    %15 = tpu.dynamic_rotate %13 by %c17_i32 dim 1 : vector<16x256xf32>, i32 -> vector<16x256xf32>
    %c0_13 = arith.constant 0 : index
    %c0_14 = arith.constant 0 : index
    %c0_15 = arith.constant 0 : index
    %16 = vector.load %arg4[%c0_13, %c0_14, %c0_15] : memref<9x16x256xf32, #tpu.memory_space<vmem>>, vector<1x16x256xf32>
    %17 = vector.shape_cast %16 : vector<1x16x256xf32> to vector<16x256xf32>
    %18 = arith.mulf %15, %17 : vector<16x256xf32>
    %c16_i32 = arith.constant 16 : i32
    %19 = tpu.dynamic_rotate %13 by %c16_i32 dim 1 : vector<16x256xf32>, i32 -> vector<16x256xf32>
    %c1 = arith.constant 1 : index
    %c0_16 = arith.constant 0 : index
    %c0_17 = arith.constant 0 : index
    %20 = vector.load %arg4[%c1, %c0_16, %c0_17] : memref<9x16x256xf32, #tpu.memory_space<vmem>>, vector<1x16x256xf32>
    %21 = vector.shape_cast %20 : vector<1x16x256xf32> to vector<16x256xf32>
    %22 = arith.mulf %19, %21 : vector<16x256xf32>
    %c15_i32 = arith.constant 15 : i32
    %23 = tpu.dynamic_rotate %13 by %c15_i32 dim 1 : vector<16x256xf32>, i32 -> vector<16x256xf32>
    %c2 = arith.constant 2 : index
    %c0_18 = arith.constant 0 : index
    %c0_19 = arith.constant 0 : index
    %24 = vector.load %arg4[%c2, %c0_18, %c0_19] : memref<9x16x256xf32, #tpu.memory_space<vmem>>, vector<1x16x256xf32>
    %25 = vector.shape_cast %24 : vector<1x16x256xf32> to vector<16x256xf32>
    %26 = arith.mulf %23, %25 : vector<16x256xf32>
    %c1_i32 = arith.constant 1 : i32
    %27 = tpu.dynamic_rotate %13 by %c1_i32 dim 1 : vector<16x256xf32>, i32 -> vector<16x256xf32>
    %c3 = arith.constant 3 : index
    %c0_20 = arith.constant 0 : index
    %c0_21 = arith.constant 0 : index
    %28 = vector.load %arg4[%c3, %c0_20, %c0_21] : memref<9x16x256xf32, #tpu.memory_space<vmem>>, vector<1x16x256xf32>
    %29 = vector.shape_cast %28 : vector<1x16x256xf32> to vector<16x256xf32>
    %30 = arith.mulf %27, %29 : vector<16x256xf32>
    %c4 = arith.constant 4 : index
    %c0_22 = arith.constant 0 : index
    %c0_23 = arith.constant 0 : index
    %31 = vector.load %arg4[%c4, %c0_22, %c0_23] : memref<9x16x256xf32, #tpu.memory_space<vmem>>, vector<1x16x256xf32>
    %32 = vector.shape_cast %31 : vector<1x16x256xf32> to vector<16x256xf32>
    %33 = arith.mulf %13, %32 : vector<16x256xf32>
    %c255_i32 = arith.constant 255 : i32
    %34 = tpu.dynamic_rotate %13 by %c255_i32 dim 1 : vector<16x256xf32>, i32 -> vector<16x256xf32>
    %c5 = arith.constant 5 : index
    %c0_24 = arith.constant 0 : index
    %c0_25 = arith.constant 0 : index
    %35 = vector.load %arg4[%c5, %c0_24, %c0_25] : memref<9x16x256xf32, #tpu.memory_space<vmem>>, vector<1x16x256xf32>
    %36 = vector.shape_cast %35 : vector<1x16x256xf32> to vector<16x256xf32>
    %37 = arith.mulf %34, %36 : vector<16x256xf32>
    %c241_i32 = arith.constant 241 : i32
    %38 = tpu.dynamic_rotate %13 by %c241_i32 dim 1 : vector<16x256xf32>, i32 -> vector<16x256xf32>
    %c6 = arith.constant 6 : index
    %c0_26 = arith.constant 0 : index
    %c0_27 = arith.constant 0 : index
    %39 = vector.load %arg4[%c6, %c0_26, %c0_27] : memref<9x16x256xf32, #tpu.memory_space<vmem>>, vector<1x16x256xf32>
    %40 = vector.shape_cast %39 : vector<1x16x256xf32> to vector<16x256xf32>
    %41 = arith.mulf %38, %40 : vector<16x256xf32>
    %c240_i32 = arith.constant 240 : i32
    %42 = tpu.dynamic_rotate %13 by %c240_i32 dim 1 : vector<16x256xf32>, i32 -> vector<16x256xf32>
    %c7 = arith.constant 7 : index
    %c0_28 = arith.constant 0 : index
    %c0_29 = arith.constant 0 : index
    %43 = vector.load %arg4[%c7, %c0_28, %c0_29] : memref<9x16x256xf32, #tpu.memory_space<vmem>>, vector<1x16x256xf32>
    %44 = vector.shape_cast %43 : vector<1x16x256xf32> to vector<16x256xf32>
    %45 = arith.mulf %42, %44 : vector<16x256xf32>
    %c239_i32 = arith.constant 239 : i32
    %46 = tpu.dynamic_rotate %13 by %c239_i32 dim 1 : vector<16x256xf32>, i32 -> vector<16x256xf32>
    %c8 = arith.constant 8 : index
    %c0_30 = arith.constant 0 : index
    %c0_31 = arith.constant 0 : index
    %47 = vector.load %arg4[%c8, %c0_30, %c0_31] : memref<9x16x256xf32, #tpu.memory_space<vmem>>, vector<1x16x256xf32>
    %48 = vector.shape_cast %47 : vector<1x16x256xf32> to vector<16x256xf32>
    %49 = arith.mulf %46, %48 : vector<16x256xf32>
    %50 = arith.addf %18, %26 : vector<16x256xf32>
    %51 = arith.addf %50, %33 : vector<16x256xf32>
    %52 = arith.addf %51, %41 : vector<16x256xf32>
    %53 = arith.addf %52, %49 : vector<16x256xf32>
    %54 = arith.addf %22, %30 : vector<16x256xf32>
    %55 = arith.addf %54, %37 : vector<16x256xf32>
    %56 = arith.addf %55, %45 : vector<16x256xf32>
    %57 = arith.addf %53, %56 : vector<16x256xf32>
    %58 = vector.broadcast %3 : vector<16x1xf32> to vector<16x256xf32>
    %59 = arith.addf %57, %58 : vector<16x256xf32>
    %cst_32 = arith.constant 0.000000e+00 : f32
    %60 = vector.broadcast %cst_32 : f32 to vector<16x256xf32>
    %61 = arith.maximumf %59, %60 : vector<16x256xf32>
    %62 = arith.truncf %61 : vector<16x256xf32> to vector<16x256xbf16>
    %cst_33 = arith.constant dense<0.000000e+00> : vector<8x256xf32>
    %63 = tpu.matmul %1, %62, %cst_33 {dimension_numbers = #tpu.dot_dimension_numbers<[1], [0], [0], [1], [0, 0, 1, 1], [], []>} : vector<8x16xbf16>, vector<16x256xbf16>, vector<8x256xf32> -> vector<8x256xf32>
    %64 = vector.broadcast %4 : vector<8x1xf32> to vector<8x256xf32>
    %65 = arith.addf %63, %64 : vector<8x256xf32>
    %66 = arith.addf %65, %14 : vector<8x256xf32>
    %c0_34 = arith.constant 0 : index
    %c0_35 = arith.constant 0 : index
    %c0_36 = arith.constant 0 : index
    %67 = vector.load %arg8[%c0_34, %c0_35, %c0_36] : memref<2x8x256xf32, #tpu.memory_space<vmem>>, vector<1x8x256xf32>
    %68 = vector.shape_cast %67 : vector<1x8x256xf32> to vector<8x256xf32>
    %69 = vector.shape_cast %66 : vector<8x256xf32> to vector<1x8x256xf32>
    tpu.vector_store %arg8[%c0_34, %c0_35, %c0_36], %69 {strides = array<i32>} : memref<2x8x256xf32, #tpu.memory_space<vmem>>, vector<1x8x256xf32>,
    %c1_37 = arith.constant 1 : index
    %c0_38 = arith.constant 0 : index
    %c0_39 = arith.constant 0 : index
    %70 = vector.load %arg1[%c1_37, %c0_38, %c0_39] : memref<2x4x256xf32, #tpu.memory_space<vmem>>, vector<1x4x256xf32>
    %71 = vector.shape_cast %70 : vector<1x4x256xf32> to vector<4x256xf32>
    %72 = arith.truncf %71 : vector<4x256xf32> to vector<4x256xbf16>
    %cst_40 = arith.constant dense<0.000000e+00> : vector<24x256xf32>
    %73 = tpu.matmul %0, %72, %cst_40 {dimension_numbers = #tpu.dot_dimension_numbers<[1], [0], [0], [1], [0, 0, 1, 1], [], []>} : vector<24x4xbf16>, vector<4x256xbf16>, vector<24x256xf32> -> vector<24x256xf32>
    %74 = vector.extract_strided_slice %73 {offsets = [0, 0], sizes = [16, 256], strides = [1, 1]} : vector<24x256xf32> to vector<16x256xf32>
    %75 = vector.broadcast %2 : vector<16x1xf32> to vector<16x256xf32>
    %76 = arith.addf %74, %75 : vector<16x256xf32>
    %cst_41 = arith.constant 0.000000e+00 : f32
    %77 = vector.broadcast %cst_41 : f32 to vector<16x256xf32>
    %78 = arith.maximumf %76, %77 : vector<16x256xf32>
    %79 = vector.extract_strided_slice %73 {offsets = [16, 0], sizes = [8, 256], strides = [1, 1]} : vector<24x256xf32> to vector<8x256xf32>
    %c17_i32_42 = arith.constant 17 : i32
    %80 = tpu.dynamic_rotate %78 by %c17_i32_42 dim 1 : vector<16x256xf32>, i32 -> vector<16x256xf32>
    %c0_43 = arith.constant 0 : index
    %c0_44 = arith.constant 0 : index
    %c0_45 = arith.constant 0 : index
    %81 = vector.load %arg4[%c0_43, %c0_44, %c0_45] : memref<9x16x256xf32, #tpu.memory_space<vmem>>, vector<1x16x256xf32>
    %82 = vector.shape_cast %81 : vector<1x16x256xf32> to vector<16x256xf32>
    %83 = arith.mulf %80, %82 : vector<16x256xf32>
    %c16_i32_46 = arith.constant 16 : i32
    %84 = tpu.dynamic_rotate %78 by %c16_i32_46 dim 1 : vector<16x256xf32>, i32 -> vector<16x256xf32>
    %c1_47 = arith.constant 1 : index
    %c0_48 = arith.constant 0 : index
    %c0_49 = arith.constant 0 : index
    %85 = vector.load %arg4[%c1_47, %c0_48, %c0_49] : memref<9x16x256xf32, #tpu.memory_space<vmem>>, vector<1x16x256xf32>
    %86 = vector.shape_cast %85 : vector<1x16x256xf32> to vector<16x256xf32>
    %87 = arith.mulf %84, %86 : vector<16x256xf32>
    %c15_i32_50 = arith.constant 15 : i32
    %88 = tpu.dynamic_rotate %78 by %c15_i32_50 dim 1 : vector<16x256xf32>, i32 -> vector<16x256xf32>
    %c2_51 = arith.constant 2 : index
    %c0_52 = arith.constant 0 : index
    %c0_53 = arith.constant 0 : index
    %89 = vector.load %arg4[%c2_51, %c0_52, %c0_53] : memref<9x16x256xf32, #tpu.memory_space<vmem>>, vector<1x16x256xf32>
    %90 = vector.shape_cast %89 : vector<1x16x256xf32> to vector<16x256xf32>
    %91 = arith.mulf %88, %90 : vector<16x256xf32>
    %c1_i32_54 = arith.constant 1 : i32
    %92 = tpu.dynamic_rotate %78 by %c1_i32_54 dim 1 : vector<16x256xf32>, i32 -> vector<16x256xf32>
    %c3_55 = arith.constant 3 : index
    %c0_56 = arith.constant 0 : index
    %c0_57 = arith.constant 0 : index
    %93 = vector.load %arg4[%c3_55, %c0_56, %c0_57] : memref<9x16x256xf32, #tpu.memory_space<vmem>>, vector<1x16x256xf32>
    %94 = vector.shape_cast %93 : vector<1x16x256xf32> to vector<16x256xf32>
    %95 = arith.mulf %92, %94 : vector<16x256xf32>
    %c4_58 = arith.constant 4 : index
    %c0_59 = arith.constant 0 : index
    %c0_60 = arith.constant 0 : index
    %96 = vector.load %arg4[%c4_58, %c0_59, %c0_60] : memref<9x16x256xf32, #tpu.memory_space<vmem>>, vector<1x16x256xf32>
    %97 = vector.shape_cast %96 : vector<1x16x256xf32> to vector<16x256xf32>
    %98 = arith.mulf %78, %97 : vector<16x256xf32>
    %c255_i32_61 = arith.constant 255 : i32
    %99 = tpu.dynamic_rotate %78 by %c255_i32_61 dim 1 : vector<16x256xf32>, i32 -> vector<16x256xf32>
    %c5_62 = arith.constant 5 : index
    %c0_63 = arith.constant 0 : index
    %c0_64 = arith.constant 0 : index
    %100 = vector.load %arg4[%c5_62, %c0_63, %c0_64] : memref<9x16x256xf32, #tpu.memory_space<vmem>>, vector<1x16x256xf32>
    %101 = vector.shape_cast %100 : vector<1x16x256xf32> to vector<16x256xf32>
    %102 = arith.mulf %99, %101 : vector<16x256xf32>
    %c241_i32_65 = arith.constant 241 : i32
    %103 = tpu.dynamic_rotate %78 by %c241_i32_65 dim 1 : vector<16x256xf32>, i32 -> vector<16x256xf32>
    %c6_66 = arith.constant 6 : index
    %c0_67 = arith.constant 0 : index
    %c0_68 = arith.constant 0 : index
    %104 = vector.load %arg4[%c6_66, %c0_67, %c0_68] : memref<9x16x256xf32, #tpu.memory_space<vmem>>, vector<1x16x256xf32>
    %105 = vector.shape_cast %104 : vector<1x16x256xf32> to vector<16x256xf32>
    %106 = arith.mulf %103, %105 : vector<16x256xf32>
    %c240_i32_69 = arith.constant 240 : i32
    %107 = tpu.dynamic_rotate %78 by %c240_i32_69 dim 1 : vector<16x256xf32>, i32 -> vector<16x256xf32>
    %c7_70 = arith.constant 7 : index
    %c0_71 = arith.constant 0 : index
    %c0_72 = arith.constant 0 : index
    %108 = vector.load %arg4[%c7_70, %c0_71, %c0_72] : memref<9x16x256xf32, #tpu.memory_space<vmem>>, vector<1x16x256xf32>
    %109 = vector.shape_cast %108 : vector<1x16x256xf32> to vector<16x256xf32>
    %110 = arith.mulf %107, %109 : vector<16x256xf32>
    %c239_i32_73 = arith.constant 239 : i32
    %111 = tpu.dynamic_rotate %78 by %c239_i32_73 dim 1 : vector<16x256xf32>, i32 -> vector<16x256xf32>
    %c8_74 = arith.constant 8 : index
    %c0_75 = arith.constant 0 : index
    %c0_76 = arith.constant 0 : index
    %112 = vector.load %arg4[%c8_74, %c0_75, %c0_76] : memref<9x16x256xf32, #tpu.memory_space<vmem>>, vector<1x16x256xf32>
    %113 = vector.shape_cast %112 : vector<1x16x256xf32> to vector<16x256xf32>
    %114 = arith.mulf %111, %113 : vector<16x256xf32>
    %115 = arith.addf %83, %91 : vector<16x256xf32>
    %116 = arith.addf %115, %98 : vector<16x256xf32>
    %117 = arith.addf %116, %106 : vector<16x256xf32>
    %118 = arith.addf %117, %114 : vector<16x256xf32>
    %119 = arith.addf %87, %95 : vector<16x256xf32>
    %120 = arith.addf %119, %102 : vector<16x256xf32>
    %121 = arith.addf %120, %110 : vector<16x256xf32>
    %122 = arith.addf %118, %121 : vector<16x256xf32>
    %123 = vector.broadcast %3 : vector<16x1xf32> to vector<16x256xf32>
    %124 = arith.addf %122, %123 : vector<16x256xf32>
    %cst_77 = arith.constant 0.000000e+00 : f32
    %125 = vector.broadcast %cst_77 : f32 to vector<16x256xf32>
    %126 = arith.maximumf %124, %125 : vector<16x256xf32>
    %127 = arith.truncf %126 : vector<16x256xf32> to vector<16x256xbf16>
    %cst_78 = arith.constant dense<0.000000e+00> : vector<8x256xf32>
    %128 = tpu.matmul %1, %127, %cst_78 {dimension_numbers = #tpu.dot_dimension_numbers<[1], [0], [0], [1], [0, 0, 1, 1], [], []>} : vector<8x16xbf16>, vector<16x256xbf16>, vector<8x256xf32> -> vector<8x256xf32>
    %129 = vector.broadcast %4 : vector<8x1xf32> to vector<8x256xf32>
    %130 = arith.addf %128, %129 : vector<8x256xf32>
    %131 = arith.addf %130, %79 : vector<8x256xf32>
    %c1_79 = arith.constant 1 : index
    %c0_80 = arith.constant 0 : index
    %c0_81 = arith.constant 0 : index
    %132 = vector.load %arg8[%c1_79, %c0_80, %c0_81] : memref<2x8x256xf32, #tpu.memory_space<vmem>>, vector<1x8x256xf32>
    %133 = vector.shape_cast %132 : vector<1x8x256xf32> to vector<8x256xf32>
    %134 = vector.shape_cast %131 : vector<8x256xf32> to vector<1x8x256xf32>
    tpu.vector_store %arg8[%c1_79, %c0_80, %c0_81], %134 {strides = array<i32>} : memref<2x8x256xf32, #tpu.memory_space<vmem>>, vector<1x8x256xf32>,
    return
  }
  func.func @transform_0(%arg0: i32) -> (i32, i32, i32) {
    %c0_i32 = arith.constant 0 : i32
    %c0_i32_0 = arith.constant 0 : i32
    %c0_i32_1 = arith.constant 0 : i32
    return %arg0, %c0_i32, %c0_i32_0 : i32, i32, i32
  }
  func.func @transform_1(%arg0: i32) -> (i32, i32) {
    %c0_i32 = arith.constant 0 : i32
    %c0_i32_0 = arith.constant 0 : i32
    %c0_i32_1 = arith.constant 0 : i32
    return %c0_i32, %c0_i32_0 : i32, i32
  }
  func.func @transform_2(%arg0: i32) -> (i32, i32) {
    %c0_i32 = arith.constant 0 : i32
    %c0_i32_0 = arith.constant 0 : i32
    %c0_i32_1 = arith.constant 0 : i32
    return %c0_i32, %c0_i32_0 : i32, i32
  }
  func.func @transform_3(%arg0: i32) -> (i32, i32, i32) {
    %c0_i32 = arith.constant 0 : i32
    %c0_i32_0 = arith.constant 0 : i32
    %c0_i32_1 = arith.constant 0 : i32
    %c0_i32_2 = arith.constant 0 : i32
    return %c0_i32, %c0_i32_0, %c0_i32_1 : i32, i32, i32
  }
  func.func @transform_4(%arg0: i32) -> (i32, i32) {
    %c0_i32 = arith.constant 0 : i32
    %c0_i32_0 = arith.constant 0 : i32
    %c0_i32_1 = arith.constant 0 : i32
    return %c0_i32, %c0_i32_0 : i32, i32
  }
  func.func @transform_5(%arg0: i32) -> (i32, i32) {
    %c0_i32 = arith.constant 0 : i32
    %c0_i32_0 = arith.constant 0 : i32
    %c0_i32_1 = arith.constant 0 : i32
    return %c0_i32, %c0_i32_0 : i32, i32
  }
  func.func @transform_6(%arg0: i32) -> (i32, i32) {
    %c0_i32 = arith.constant 0 : i32
    %c0_i32_0 = arith.constant 0 : i32
    %c0_i32_1 = arith.constant 0 : i32
    return %c0_i32, %c0_i32_0 : i32, i32
  }
  func.func @transform_7(%arg0: i32) -> (i32, i32, i32) {
    %c0_i32 = arith.constant 0 : i32
    %c0_i32_0 = arith.constant 0 : i32
    %c0_i32_1 = arith.constant 0 : i32
    return %arg0, %c0_i32, %c0_i32_0 : i32, i32, i32
  }
}

</mosaic_0001>

<bundles_post_ra>
// kernel: tpu_custom_call.1
= control target key start
LH: loop header
LB: loop body
LE: loop exit
PB: predicated region body
PF: predicated region fallthrough
CT: control target
= control target key end

     0   :  { %12 = vsyncpa [#allocation3], 0  ;;  %s2099_s0 = inlined_call_operand.vmem [shape: f32[4,4,256], index: 0, kind: input, shape index: {}]   ;;  %s2100_s1 = inlined_call_operand.vmem [shape: bf16[24,4], index: 1, kind: input, shape index: {}]   ;;  %s2101_s2 = inlined_call_operand.vmem [shape: f32[16,1], index: 2, kind: input, shape index: {}]   ;;  %s2102_s3 = inlined_call_operand.hbm [shape: f32[9,16,256], index: 3, kind: input, shape index: {}]   ;;  %s2103_s4 = inlined_call_operand.vmem [shape: f32[16,1], index: 4, kind: input, shape index: {}]   ;;  %s2104_s5 = inlined_call_operand.vmem [shape: bf16[8,16], index: 5, kind: input, shape index: {}]   ;;  %s2105_s6 = inlined_call_operand.vmem [shape: f32[8,1], index: 6, kind: input, shape index: {}]   ;;  %s2106_s7 = inlined_call_operand.hbm [shape: f32[4,8,256], index: 7, kind: output, shape index: {}]  }
   0x1   :  { %13 = vsyncpa [#allocation4], 0 }
   0x2   :  { %15 = vsyncpa [#allocation4 + $0x1], 0  ;;  %s1360_s24 = smov 0   ;;  %s1362_s25 = smov 0  }
   0x3   :  { %s1364_s26 = smov 0   ;;  %s1366_s27 = smov 0  }
   0x4 LB: > { %s1381_s28 = sadd.s32 4294967295, %s1304_s27   ;;  %s1114_s29 = sadd.s32 4294967294, %s1304_s27   ;;  %s1304_s27 = sphi %s1366_s27, %s2164_s27   ;;  %s1300_s26 = sphi %s1364_s26, %s2163_s26   ;;  %s1296_s25 = sphi %s1362_s25, %s2162_s25   ;;  %s1292_s24 = sphi %s1360_s24, %s2161_s24  }
   0x5   : > { %s1385_s30 = sadd.s32 1, %s1304_s27   ;;  %s180_s8 = sadd.s32 1, %s1300_s26 }
   0x6   : > { %s177_s9 = ssub.s32 %s1304_s27, %s1385_s30  ;;  %p190_p0 = scmp.ne.s32.totalorder %s1300_s26, %s1296_s25 }
   0x7   : > { %p178_p1 = scmp.eq.s32.totalorder %s177_s9, 0  ;;  %p191_p2 = scmp.eq.s32.totalorder %s1381_s28, 1 }
   0x8   : > { %p196_p3 = scmp.ne.s32.totalorder %s1296_s25, %s1292_s24  ;;  %p197_p4 = scmp.eq.s32.totalorder %s1114_s29, 1 }
   0x9   : > { %s1396_s10 = scalar_select %p178_p1, %s1300_s26, %s180_s8  }
   0xa   : > { %p1398_p5 = por %p191_p2, %p190_p0  ;;  %p1402_p6 = por %p197_p4, %p196_p3 }
   0xb   : > { %p1115_p7 = scmp.ge.s32.totalorder %s1304_s27, 1  ;;  %p204_p8 = scmp.lt.s32.totalorder %s1304_s27, 3 }
   0xc   : > { %s2125_s12 = scalar_select %p1402_p6, 1, 0 }
   0xd   : > { %p1160_p9 = scmp.eq.s32.totalorder %s1381_s28, 0  ;;  %p1409_p10 = pnand %p1115_p7, %p204_p8 }
   0xe   : > { %s1306_s14 = smov [#allocation2]  }
   0xf   : > { %s222_s15 = sshll.u32 %s1306_s14, 4  ;;  %p1152_p11 = pneg %p1409_p10  ;;  %s223_s15 = int_to_ptr.vmem [resolvable:$true] %s222_s15 }
  0x10   : > { %s1225_s16 = scalar_lea.vmem %s223_s15, 4608  ;;  %p1233_p3 = scmp.lt.s32.totalorder %s223_s15, %s223_s15 }
  0x11   : > { %p1153_p12 = pnand %p1160_p9, %p1152_p11  ;;  %p1226_p0 = scmp.ne.s32.totalorder %s223_s15, %s1225_s16 }
  0x12   : > { %p1234_p4 = scmp.lt.s32.totalorder %s1225_s16, %s1225_s16 }
  0x13   : > { %p1216_p13 = pneg %p1153_p12 }
  0x14   : > { %p1235_p6 = por %p1234_p4, %p1233_p3 }
  0x15   : > { %p1228_p1 = pnand %p1226_p0, %p1216_p13 }
  0x17   : > { %p1229_p2 = pneg %p1228_p1 }
  0x19   : > { %p1236_p7 = pnand %p1235_p6, %p1229_p2 }
  0x1b   : > { %1239 = shalt.err (!%p1236_p7)
}
  0x1c   : > { %s1307_s17 = smov 256   ;;  %s1308_s18 = smov 16  }
  0x1d   : > { %1155 = dma.hbm_to_vmem [thread:$0]  (!%p1153_p12), %s2102_s3, 4608, %s223_s15, [#allocation3], %s1307_s17, %s1307_s17, %s1308_s18  }
  0x1e   : > { %257 = sbr.rel (%p1409_p10) target bundleno = 1064 (0x428), region = 48 }
  0x23   : > { %1283 = dma.done.wait (%p1160_p9), [#allocation3], 4608  }
  0x24   : > { %1285 = vsyncadd (%p1160_p9), [#allocation3], 4294962688  ;;  %s1121_s21 = sshll.u32 %s1381_s28, 1  ;;  %v2107_v0 = vmov 0   ;;  %vm329_vm0 = vcmask 1041408   ;;  %v303_v4 = vld [vmem:[%s2101_s2] sm:$0xff]  ;;  %v413_v45 = vlaneseq }
  0x25   : > { %p291_p8 = scmp.lt.s32.totalorder %s1121_s21, 3  ;;  %368 = vmatprep.mubr.bf16.mxu0 %v2107_v0  ;;  %1208 = vset.pattern.permute.xlu0 %v2107_v0  ;;  %v304_v7 = vld [vmem:[%s2101_s2 + $0x8] sm:$0xff]  ;;  %v1448_v8 = vld [vmem:[%s2100_s1] sm:$0xff]   ;;  %vm322_vm1 = vcmask 31744   ;;  %s1310_s18 = smov 15   ;;  %v1579_v57 = vld [vmem:[#allocation2 + $0x90] sm:$0xff] }
  0x26   : > { %1209 = vset.pattern.permute.xlu1 %v2107_v0  ;;  %684 = vmatprep.mubr.bf16.mxu1 %v2107_v0  ;;  %s1311_s19 = smov 17   ;;  %s1312_s20 = smov 16   ;;  %v305_v23 = vld [vmem:[%s2103_s4] sm:$0xff]  ;;  %v306_v24 = vld [vmem:[%s2103_s4 + $0x8] sm:$0xff]  ;;  %v1561_v48 = vand.u32 127, %v413_v45  ;;  %vm648_vm10 = vcmask 130048  }
  0x27   : > { %s2166_s21 = smov (!%p291_p8, %s1121_s21), 3  ;;  %389 = vperm.xlu0 %1208, %v303_v4   ;;  %s1315_s23 = smov 113   ;;  %v1567_v51 = vld [vmem:[#allocation2 + $0x80] sm:$0xff]  ;;  %v1571_v53 = vld [vmem:[#allocation2 + $0x48] sm:$0xff]  ;;  %v1598_v4 = vld [vmem:[#allocation2 + $0x50] sm:$0xff] }
  0x28   : > { %s1143_s22 = sshll.u32 %s2166_s21, 3  ;;  %s1313_s21 = smov 1   ;;  %vm458_vm2 = vcmp.lt.s32.totalorder %v1561_v48, 15  ;;  %vm415_vm3 = vcmp.lt.s32.totalorder %v1561_v48, 17  ;;  %v1569_v52 = vld [vmem:[#allocation2 + $0x40] sm:$0xff]  ;;  %v1577_v56 = vld [vmem:[#allocation2 + $0x88] sm:$0xff] }
  0x29   : > { %s1434_s8 = scalar_lea.vmem %s2099_s0, %s1143_s22  ;;  %s1314_s22 = smov 127   ;;  %v1581_v58 = vld [vmem:[#allocation2] sm:$0xff]  ;;  %v1583_v59 = vld [vmem:[#allocation2 + $0x8] sm:$0xff]  ;;  %vm480_vm4 = vcmp.lt.s32.totalorder %v1561_v48, 1  ;;  %vm436_vm5 = vcmp.lt.s32.totalorder %v1561_v48, 16  ;;  %vm511_vm6 = vcmp.lt.s32.totalorder %v1561_v48, 127 }
  0x2a   : > { %v308_v1 = vld [vmem:[%s1434_s8] sm:$0xff]  ;;  %s1316_s29 = smov 112   ;;  %s1317_s9 = smov 111   ;;  %vm533_vm7 = vcmp.lt.s32.totalorder %v1561_v48, 113  ;;  %vm555_vm8 = vcmp.lt.s32.totalorder %v1561_v48, 112  ;;  %vm577_vm9 = vcmp.lt.s32.totalorder %v1561_v48, 111 }
  0x2b   : > { %v310_v2 = vcombine.high %v308_v1, %v308_v1  ;;  %v312_v3 = vpack.c.bf16 %v308_v1, %v308_v1  ;;  %394 = vperm.xlu0 %1208, %v304_v7   ;;  %s1318_s13 = smov [#allocation5]  }
  0x2c   : > { %s1244_s14 = sshll.u32 %s1318_s13, 4  ;;  %s1245_s14 = int_to_ptr.vmem [resolvable:$false] %s1244_s14 }
  0x2d   : > { %v313_v5 = vpack.c.bf16 %v310_v2, %v310_v2  ;;  %v331_v6 = vsel %vm329_vm0, %v312_v3, 0 }
  0x2f   : > { %1126 = vmatprep.subr.msk.bf16.mxu0 %vm329_vm0, %v313_v5  ;;  %v1600_v5 = vld [vmem:[#allocation2 + $0x58] sm:$0xff] }
  0x30   : > { %351 = vmatpush1.bf16.msra.mxu0 %v331_v6 }
  0x33   : > { %1127 = vmatmul.mubr.msk.bf16.vlgmr.msra.gmra.mxu0 %vm322_vm1, %v1448_v8 }
  0x34   : > { %378 = vmatprep.mubr.bf16.mxu0 %v2107_v0  ;;  %v1712_v0 = vld [vmem:[#allocation2 + $0x100] sm:$0xff] }
  0x35   : > { %2134 = vst [vmem:[#allocation15_spill] sm:$0xff] %v1712_v0 }
  0xa2   : > { %v1453_v9 = vpop.permute.xlu0 %389 }
  0xa6   : > { %v1458_v14 = vpop.permute.xlu0 %394 }
  0xf3   : > { %v370_v10 = vpop.f32.mrf.mxu0 }
  0xf4   : > { %v397_v11 = vadd.f32 %v1453_v9, %v370_v10 }
  0xf5   : > { %v372_v12 = vpop.f32.mrf.mxu0 }
  0xf6   : > { %v1456_v13 = vmax.f32 %v397_v11, 0.0  ;;  %v398_v18 = vadd.f32 %v1453_v9, %v372_v12 }
  0xf7   : > { %v374_v15 = vpop.f32.mrf.mxu0 }
  0xf8   : > { %v399_v16 = vadd.f32 %v1458_v14, %v374_v15  ;;  %450 = vrot.lane.b32.xlu0 %v1456_v13, %s1310_s18  ;;  %405 = vrot.lane.b32.xlu1 %v1456_v13, %s1311_s19  ;;  %v1492_v19 = vmax.f32 %v398_v18, 0.0  ;;  %v499_v62 = vmul.f32 %v1567_v51, %v1456_v13  ;;  %v1616_v15 = vld [vmem:[#allocation2 + $0x10] sm:$0xff] }
  0xf9   : > { %v376_v20 = vpop.f32.mrf.mxu0 }
  0xfa   : > { %v1465_v17 = vmax.f32 %v399_v16, 0.0  ;;  %v400_v21 = vadd.f32 %v1458_v14, %v376_v20  ;;  %v500_v10 = vmul.f32 %v1577_v56, %v1492_v19  ;;  %v1618_v16 = vld [vmem:[#allocation2 + $0x18] sm:$0xff] }
  0xfc   : > { %428 = vrot.lane.b32.xlu0 %v1456_v13, %s1312_s20  ;;  %407 = vrot.lane.b32.xlu1 %v1465_v17, %s1311_s19  ;;  %v1503_v22 = vmax.f32 %v400_v21, 0.0  ;;  %v1612_v11 = vmul.f32 %v1579_v57, %v1465_v17  ;;  %v1624_v21 = vld [vmem:[#allocation2 + $0x60] sm:$0xff] }
 0x100   : > { %472 = vrot.lane.b32.xlu0 %v1456_v13, %s1313_s21  ;;  %452 = vrot.lane.b32.xlu1 %v1465_v17, %s1310_s18 }
 0x104   : > { %503 = vrot.lane.b32.xlu0 %v1456_v13, %s1314_s22  ;;  %430 = vrot.lane.b32.xlu1 %v1465_v17, %s1312_s20 }
 0x108   : > { %525 = vrot.lane.b32.xlu0 %v1456_v13, %s1315_s23  ;;  %474 = vrot.lane.b32.xlu1 %v1465_v17, %s1313_s21 }
 0x10c   : > { %547 = vrot.lane.b32.xlu0 %v1456_v13, %s1316_s29  ;;  %505 = vrot.lane.b32.xlu1 %v1465_v17, %s1314_s22 }
 0x110   : > { %569 = vrot.lane.b32.xlu0 %v1456_v13, %s1317_s9  ;;  %527 = vrot.lane.b32.xlu1 %v1465_v17, %s1315_s23 }
 0x114   : > { %409 = vrot.lane.b32.xlu0 %v1492_v19, %s1311_s19  ;;  %549 = vrot.lane.b32.xlu1 %v1465_v17, %s1316_s29 }
 0x118   : > { %454 = vrot.lane.b32.xlu0 %v1492_v19, %s1310_s18  ;;  %571 = vrot.lane.b32.xlu1 %v1465_v17, %s1317_s9 }
 0x11c   : > { %432 = vrot.lane.b32.xlu0 %v1492_v19, %s1312_s20  ;;  %411 = vrot.lane.b32.xlu1 %v1503_v22, %s1311_s19 }
 0x120   : > { %476 = vrot.lane.b32.xlu0 %v1492_v19, %s1313_s21  ;;  %456 = vrot.lane.b32.xlu1 %v1503_v22, %s1310_s18 }
 0x124   : > { %507 = vrot.lane.b32.xlu0 %v1492_v19, %s1314_s22  ;;  %434 = vrot.lane.b32.xlu1 %v1503_v22, %s1312_s20 }
 0x128   : > { %529 = vrot.lane.b32.xlu0 %v1492_v19, %s1315_s23  ;;  %478 = vrot.lane.b32.xlu1 %v1503_v22, %s1313_s21 }
 0x12c   : > { %551 = vrot.lane.b32.xlu0 %v1492_v19, %s1316_s29  ;;  %509 = vrot.lane.b32.xlu1 %v1503_v22, %s1314_s22 }
 0x130   : > { %573 = vrot.lane.b32.xlu0 %v1492_v19, %s1317_s9  ;;  %531 = vrot.lane.b32.xlu1 %v1503_v22, %s1315_s23  ;;  %v1626_v19 = vld [vmem:[#allocation2 + $0x68] sm:$0xff] }
 0x134   : > { %625 = vperm.xlu0 %1208, %v305_v23   ;;  %553 = vrot.lane.b32.xlu1 %v1503_v22, %s1316_s29 }
 0x138   : > { %575 = vrot.lane.b32.xlu1 %v1503_v22, %s1317_s9 }
 0x13c   : > { %630 = vperm.xlu1 %1209, %v306_v24  }
 0x16a   : > { %v451_v25 = vpop.permute.xlu0 %450  ;;  %v406_v26 = vpop.permute.xlu1 %405 }
 0x16e   : > { %v1539_v27 = vpop.permute.xlu0 %428  ;;  %v408_v28 = vpop.permute.xlu1 %407 }
 0x172   : > { %v473_v29 = vpop.permute.xlu0 %472  ;;  %v453_v30 = vpop.permute.xlu1 %452 }
 0x176   : > { %v1541_v31 = vpop.permute.xlu0 %503  ;;  %v1543_v32 = vpop.permute.xlu1 %430 }
 0x17a   : > { %v1545_v33 = vpop.permute.xlu0 %525  ;;  %v1547_v34 = vpop.permute.xlu1 %474 }
 0x17e   : > { %v1549_v35 = vpop.permute.xlu0 %547  ;;  %v1551_v36 = vpop.permute.xlu1 %505 }
 0x182   : > { %v1553_v37 = vpop.permute.xlu0 %569  ;;  %v1555_v38 = vpop.permute.xlu1 %527 }
 0x186   : > { %v410_v39 = vpop.permute.xlu0 %409  ;;  %v1557_v40 = vpop.permute.xlu1 %549 }
 0x187   : > { %v416_v60 = vsel %vm415_vm3, %v406_v26, %v410_v39  ;;  %v418_v61 = vsel %vm415_vm3, %v410_v39, %v406_v26 }
 0x188   : > { %v424_v12 = vmul.f32 %v1581_v58, %v418_v61  ;;  %v425_v13 = vmul.f32 %v1583_v59, %v416_v60  ;;  %v1652_v60 = vld [vmem:[#allocation2 + $0xa8] sm:$0xff] }
 0x189   : > { %2128 = vst [vmem:[#allocation9_spill] sm:$0xff] %v1652_v60 }
 0x18a   : > { %v455_v41 = vpop.permute.xlu0 %454  ;;  %v1559_v42 = vpop.permute.xlu1 %571 }
 0x18b   : > { %v459_v54 = vsel %vm458_vm2, %v451_v25, %v455_v41  ;;  %v461_v55 = vsel %vm458_vm2, %v455_v41, %v451_v25  ;;  %v1638_v41 = vld [vmem:[#allocation2 + $0x20] sm:$0xff] }
 0x18c   : > { %v468_v2 = vmul.f32 %v1569_v52, %v461_v55  ;;  %v469_v3 = vmul.f32 %v1571_v53, %v459_v54  ;;  %v1650_v55 = vld [vmem:[#allocation2 + $0xa0] sm:$0xff] }
 0x18d   : > { %2127 = vst [vmem:[#allocation8_spill] sm:$0xff] %v1650_v55 }
 0x18e   : > { %v433_v43 = vpop.permute.xlu0 %432  ;;  %v412_v44 = vpop.permute.xlu1 %411  ;;  %v591_v39 = vadd.f32 %v468_v2, %v424_v12 }
 0x18f   : > { %v417_v18 = vsel %vm415_vm3, %v408_v28, %v412_v44  ;;  %v419_v20 = vsel %vm415_vm3, %v412_v44, %v408_v28  ;;  %v592_v28 = vadd.f32 %v469_v3, %v425_v13  ;;  %v1640_v44 = vld [vmem:[#allocation2 + $0x28] sm:$0xff]  ;;  %v437_v45 = vsel %vm436_vm5, %v1539_v27, %v433_v43 }
 0x190   : > { %v427_v54 = vmul.f32 %v1618_v16, %v417_v18 }
 0x192   : > { %v477_v46 = vpop.permute.xlu0 %476  ;;  %v457_v47 = vpop.permute.xlu1 %456 }
 0x193   : > { %v460_v6 = vsel %vm458_vm2, %v453_v30, %v457_v47  ;;  %v462_v7 = vsel %vm458_vm2, %v457_v47, %v453_v30  ;;  %v481_v17 = vsel %vm480_vm4, %v473_v29, %v477_v46  ;;  %v483_v23 = vsel %vm480_vm4, %v477_v46, %v473_v29  ;;  %v1636_v30 = vld [vmem:[#allocation2 + $0x98] sm:$0xff] }
 0x194   : > { %v470_v24 = vmul.f32 %v1598_v4, %v462_v7  ;;  %v471_v25 = vmul.f32 %v1600_v5, %v460_v6  ;;  %v439_v29 = vsel %vm436_vm5, %v433_v43, %v1539_v27  ;;  %v426_v47 = vmul.f32 %v1616_v15, %v419_v20 }
 0x195   : > { %v490_v3 = vmul.f32 %v1624_v21, %v483_v23  ;;  %v491_v27 = vmul.f32 %v1626_v19, %v481_v17  ;;  %v502_v43 = vmul.f32 %v1636_v30, %v1503_v22  ;;  %v446_v6 = vmul.f32 %v1638_v41, %v439_v29  ;;  %v1671_v23 = vld [vmem:[#allocation2 + $0x38] sm:$0xff] }
 0x196   : > { %v508_v49 = vpop.permute.xlu0 %507  ;;  %v1564_v50 = vpop.permute.xlu1 %434  ;;  %v447_v7 = vmul.f32 %v1640_v44, %v437_v45  ;;  %v593_v12 = vadd.f32 %v470_v24, %v426_v47  ;;  %v594_v13 = vadd.f32 %v471_v25, %v427_v54  ;;  %2129 = vst [vmem:[#allocation10_spill] sm:$0xff] %v1671_v23  ;;  %v595_v24 = vadd.f32 %v591_v39, %v499_v62  ;;  %v1683_v47 = vld [vmem:[#allocation2 + $0xc0] sm:$0xff]  ;;  %v1685_v54 = vld [vmem:[#allocation2 + $0xc8] sm:$0xff]  ;;  %v1697_v39 = vld [vmem:[#allocation2 + $0x70] sm:$0xff] }
 0x197   : > { %v512_v61 = vsel %vm511_vm6, %v1541_v31, %v508_v49  ;;  %v514_v2 = vsel %vm511_vm6, %v508_v49, %v1541_v31  ;;  %v1669_v49 = vld [vmem:[#allocation2 + $0x30] sm:$0xff]  ;;  %v438_v22 = vsel %vm436_vm5, %v1543_v32, %v1564_v50  ;;  %v440_v17 = vsel %vm436_vm5, %v1564_v50, %v1543_v32  ;;  %2130 = vst [vmem:[#allocation11_spill] sm:$0xff] %v1683_v47 }
 0x198   : > { %v521_v20 = vmul.f32 %v1650_v55, %v512_v61  ;;  %v522_v31 = vmul.f32 %v1652_v60, %v514_v2  ;;  %v596_v25 = vadd.f32 %v592_v28, %v500_v10  ;;  %v607_v45 = vadd.f32 %v490_v3, %v446_v6  ;;  %2131 = vst [vmem:[#allocation12_spill] sm:$0xff] %v1685_v54  ;;  %v1699_v28 = vld [vmem:[#allocation2 + $0x78] sm:$0xff]  ;;  %v1714_v60 = vld [vmem:[#allocation2 + $0x108] sm:$0xff] }
 0x199   : > { %v608_v29 = vadd.f32 %v491_v27, %v447_v7  ;;  %v448_v62 = vmul.f32 %v1669_v49, %v440_v17  ;;  %v449_v10 = vmul.f32 %v1671_v23, %v438_v22  ;;  %2132 = vst [vmem:[#allocation13_spill] sm:$0xff] %v1697_v39  ;;  %2133 = vst [vmem:[#allocation14_spill] sm:$0xff] %v1699_v28 }
 0x19a   : > { %v1592_v63 = vpop.permute.xlu0 %529  ;;  %v1594_v1 = vpop.permute.xlu1 %478  ;;  %v597_v6 = vadd.f32 %v593_v12, %v1612_v11  ;;  %v598_v7 = vadd.f32 %v594_v13, %v502_v43  ;;  %2135 = vst [vmem:[#allocation16_spill] sm:$0xff] %v1714_v60  ;;  %v1724_v43 = vld [vmem:[#allocation2 + $0xd0] sm:$0xff]  ;;  %v1726_v12 = vld [vmem:[#allocation2 + $0xd8] sm:$0xff] }
 0x19b   : > { %v534_v61 = vsel %vm533_vm7, %v1545_v33, %v1592_v63  ;;  %v536_v32 = vsel %vm533_vm7, %v1592_v63, %v1545_v33  ;;  %v482_v2 = vsel %vm480_vm4, %v1547_v34, %v1594_v1  ;;  %v484_v3 = vsel %vm480_vm4, %v1594_v1, %v1547_v34  ;;  %2136 = vst [vmem:[#allocation17_spill] sm:$0xff] %v1724_v43 }
 0x19c   : > { %v611_v63 = vadd.f32 %v607_v45, %v521_v20  ;;  %v612_v27 = vadd.f32 %v608_v29, %v522_v31  ;;  %v543_v22 = vmul.f32 %v1683_v47, %v534_v61  ;;  %v544_v17 = vmul.f32 %v1685_v54, %v536_v32  ;;  %2137 = vst [vmem:[#allocation18_spill] sm:$0xff] %v1726_v12  ;;  %v1734_v31 = vld [vmem:[#allocation2 + $0xe0] sm:$0xff]  ;;  %v1736_v45 = vld [vmem:[#allocation2 + $0xe8] sm:$0xff]  ;;  %v1744_v61 = vld [vmem:[#allocation2 + $0xb0] sm:$0xff] }
 0x19d   : > { %v492_v1 = vmul.f32 %v1697_v39, %v484_v3  ;;  %v493_v11 = vmul.f32 %v1699_v28, %v482_v2  ;;  %2138 = vst [vmem:[#allocation19_spill] sm:$0xff] %v1734_v31  ;;  %2139 = vst [vmem:[#allocation20_spill] sm:$0xff] %v1736_v45  ;;  %v1774_v39 = vld [vmem:[#allocation2 + $0xf8] sm:$0xff] }
 0x19e   : > { %v1634_v26 = vpop.permute.xlu1 %509  ;;  %v552_v46 = vpop.permute.xlu0 %551 }
 0x19f   : > { %v558_v29 = vsel %vm555_vm8, %v552_v46, %v1549_v35  ;;  %v513_v32 = vsel %vm511_vm6, %v1551_v36, %v1634_v26 }
 0x1a2   : > { %v532_v18 = vpop.permute.xlu1 %531  ;;  %v574_v50 = vpop.permute.xlu0 %573 }
 0x1a3   : > { %v578_v55 = vsel %vm577_vm9, %v1553_v37, %v574_v50  ;;  %v580_v34 = vsel %vm577_vm9, %v574_v50, %v1553_v37  ;;  %v535_v13 = vsel %vm533_vm7, %v1555_v38, %v532_v18  ;;  %v537_v20 = vsel %vm533_vm7, %v532_v18, %v1555_v38  ;;  %v1754_v50 = vld [vmem:[#allocation2 + $0xb8] sm:$0xff] }
 0x1a4   : > { %v556_v37 = vsel %vm555_vm8, %v1549_v35, %v552_v46  ;;  %v515_v38 = vsel %vm511_vm6, %v1634_v26, %v1551_v36  ;;  %2140 = vst [vmem:[#allocation21_spill] sm:$0xff] %v1754_v50  ;;  %v587_v2 = vmul.f32 %v1712_v0, %v578_v55  ;;  %v588_v3 = vmul.f32 %v1714_v60, %v580_v34  ;;  %v1758_v35 = vld [vmem:[#allocation2 + $0x110] sm:$0xff]  ;;  %v1760_v46 = vld [vmem:[#allocation2 + $0x118] sm:$0xff] }
 0x1a5   : > { %v599_v36 = vadd.f32 %v595_v24, %v543_v22  ;;  %v600_v26 = vadd.f32 %v596_v25, %v544_v17  ;;  %v545_v28 = vmul.f32 %v1724_v43, %v535_v13  ;;  %v546_v55 = vmul.f32 %v1726_v12, %v537_v20  ;;  %v1772_v0 = vld [vmem:[#allocation2 + $0xf0] sm:$0xff] }
 0x1a6   : > { %v554_v33 = vpop.permute.xlu1 %553  ;;  %v565_v34 = vmul.f32 %v1734_v31, %v556_v37  ;;  %v566_v60 = vmul.f32 %v1736_v45, %v558_v29  ;;  %v523_v24 = vmul.f32 %v1744_v61, %v513_v32  ;;  %v524_v25 = vmul.f32 %v1754_v50, %v515_v38 }
 0x1a7   : > { %v557_v23 = vsel %vm555_vm8, %v1557_v40, %v554_v33  ;;  %v609_v13 = vadd.f32 %v492_v1, %v448_v62  ;;  %v610_v20 = vadd.f32 %v493_v11, %v449_v10  ;;  %v603_v37 = vadd.f32 %v599_v36, %v587_v2  ;;  %v1130_v11 = vld [vmem:[%s1434_s8 + $0x8] sm:$0xff] }
 0x1a8   : > { %v604_v29 = vadd.f32 %v600_v26, %v588_v3  ;;  %v602_v12 = vadd.f32 %v598_v7, %v546_v55  ;;  %v567_v43 = vmul.f32 %v1772_v0, %v557_v23  ;;  %v1800_v55 = vld [vmem:[%s2104_s5] sm:$0xf] }
 0x1a9   : > { %v613_v32 = vadd.f32 %v609_v13, %v523_v24  ;;  %v614_v31 = vadd.f32 %v610_v20, %v524_v25  ;;  %2141 = vst [vmem:[#allocation22_spill] sm:$0xff] %v1800_v55  ;;  %v1213_v24 = vld [vmem:[%s2100_s1 + $0x8] ss:$0 sps:$4 sm:$0xff]  }
 0x1aa   : > { %v576_v18 = vpop.permute.xlu1 %575  ;;  %1128 = vmatmul.mubr.msk.bf16.gmra.mxu0 %vm322_vm1, %v1213_v24 }
 0x1ab   : > { %v579_v54 = vsel %vm577_vm9, %v1559_v42, %v576_v18  ;;  %v581_v47 = vsel %vm577_vm9, %v576_v18, %v1559_v42  ;;  %v559_v42 = vsel %vm555_vm8, %v554_v33, %v1557_v40  ;;  %v601_v18 = vadd.f32 %v597_v6, %v545_v28 }
 0x1ac   : > { %v589_v22 = vmul.f32 %v1758_v35, %v579_v54  ;;  %v590_v17 = vmul.f32 %v1760_v46, %v581_v47  ;;  %v568_v45 = vmul.f32 %v1774_v39, %v559_v42  ;;  %v615_v40 = vadd.f32 %v611_v63, %v565_v34 }
 0x1ad   : > { %v616_v33 = vadd.f32 %v612_v27, %v566_v60  ;;  %v617_v47 = vadd.f32 %v613_v32, %v567_v43  ;;  %v700_v60 = vcombine.high %v1130_v11, %v1130_v11  ;;  %v2142_v42 = vmov 0  }
 0x1ae   : > { %v605_v38 = vadd.f32 %v601_v18, %v589_v22  ;;  %v606_v50 = vadd.f32 %v602_v12, %v590_v17  ;;  %v618_v62 = vadd.f32 %v614_v31, %v568_v45  ;;  %v619_v1 = vadd.f32 %v615_v40, %v603_v37  ;;  %1011 = vmatprep.mubr.bf16.mxu0 %v2142_v42 }
 0x1af   : > { %v1788_v54 = vpop.permute.xlu0 %625  ;;  %v620_v10 = vadd.f32 %v616_v33, %v604_v29  ;;  %v703_v45 = vpack.c.bf16 %v700_v60, %v700_v60 }
 0x1b0   : > { %v622_v2 = vadd.f32 %v618_v62, %v606_v50  ;;  %v621_v6 = vadd.f32 %v617_v47, %v605_v38  ;;  %v633_v23 = vadd.f32 %v1788_v54, %v619_v1  ;;  %v702_v50 = vpack.c.bf16 %v1130_v11, %v1130_v11 }
 0x1b1   : > { %v634_v28 = vadd.f32 %v1788_v54, %v620_v10 }
 0x1b2   : > { %v637_v43 = vmax.f32 %v633_v23, 0.0  ;;  %v705_v34 = vsel %vm329_vm0, %v702_v50, 0 }
 0x1b3   : > { %v638_v12 = vmax.f32 %v634_v28, 0.0 }
 0x1b7   : > { %v1793_v7 = vpop.permute.xlu1 %630 }
 0x1b8   : > { %v636_v63 = vadd.f32 %v1793_v7, %v622_v2  ;;  %v635_v27 = vadd.f32 %v1793_v7, %v621_v6 }
 0x1ba   : > { %v640_v3 = vmax.f32 %v636_v63, 0.0  ;;  %v639_v31 = vmax.f32 %v635_v27, 0.0 }
 0x1bc   : > { %v642_v36 = vpack.c.bf16 %v640_v3, %v638_v12  ;;  %v641_v26 = vpack.c.bf16 %v639_v31, %v637_v43 }
 0x1be   : > { %666 = vmatprep.subr.bf16.mxu1 %v642_v36 }
 0x1bf   : > { %667 = vmatpush1.bf16.msra.mxu1 %v641_v26 }
 0x1c0   : > { %1131 = vmatprep.subr.msk.bf16.mxu1 %vm329_vm0, %v703_v45 }
 0x1c2   : > { %1129 = vmatmul.mubr.msk.bf16.vlgmr.msra.gmra.mxu1 %vm648_vm10, %v1800_v55 }
 0x1c3   : > { %725 = vmatpush1.bf16.msra.mxu1 %v705_v34  ;;  %742 = vmatprep.mubr.bf16.mxu1 %v2142_v42 }
 0x1ca   : > { %1132 = vmatmul.mubr.msk.bf16.vlgmr.msra.gmra.mxu1 %vm322_vm1, %v1448_v8 }
 0x1cb   : > { %752 = vmatprep.mubr.bf16.mxu1 %v2142_v42 }
 0x1d2   : > { %1133 = vmatmul.mubr.msk.bf16.gmra.mxu1 %vm322_vm1, %v1213_v24 }
 0x282   : > { %v1816_v25 = vpop.f32.mrf.mxu1 }
 0x284   : > { %v1818_v22 = vpop.f32.mrf.mxu1 }
 0x286   : > { %v690_v17 = vpop.f32.mrf.mxu1 }
 0x288   : > { %v691_v13 = vpop.f32.mrf.mxu1 }
 0x28a   : > { %v744_v20 = vpop.f32.mrf.mxu1 }
 0x28b   : > { %v761_v8 = vadd.f32 %v744_v20, %v1453_v9 }
 0x28c   : > { %v746_v37 = vpop.f32.mrf.mxu1 }
 0x28d   : > { %v1821_v29 = vmax.f32 %v761_v8, 0.0  ;;  %v762_v32 = vadd.f32 %v746_v37, %v1453_v9  ;;  %v1894_v9 = vpop.f32.mrf.mxu0 }
 0x28e   : > { %v748_v18 = vpop.f32.mrf.mxu1 }
 0x28f   : > { %v763_v40 = vadd.f32 %v748_v18, %v1458_v14  ;;  %769 = vrot.lane.b32.xlu0 %v1821_v29, %s1311_s19  ;;  %v1857_v47 = vmax.f32 %v762_v32, 0.0  ;;  %v1899_v1 = vpop.f32.mrf.mxu0 }
 0x290   : > { %v750_v38 = vpop.f32.mrf.mxu1  ;;  %2143 = vst [vmem:[#allocation23_spill] sm:$0xff] %v1899_v1 }
 0x291   : > { %v1826_v33 = vmax.f32 %v763_v40, 0.0  ;;  %v764_v62 = vadd.f32 %v750_v38, %v1458_v14  ;;  %v307_v14 = vld [vmem:[%s2105_s6] sm:$0xff]  ;;  %v384_v11 = vpop.f32.mrf.mxu0 }
 0x293   : > { %809 = vrot.lane.b32.xlu0 %v1821_v29, %s1310_s18  ;;  %771 = vrot.lane.b32.xlu1 %v1826_v33, %s1311_s19  ;;  %v1864_v10 = vmax.f32 %v764_v62, 0.0  ;;  %v385_v2 = vpop.f32.mrf.mxu0 }
 0x297   : > { %789 = vrot.lane.b32.xlu0 %v1821_v29, %s1312_s20  ;;  %811 = vrot.lane.b32.xlu1 %v1826_v33, %s1310_s18 }
 0x29b   : > { %829 = vrot.lane.b32.xlu0 %v1821_v29, %s1313_s21  ;;  %791 = vrot.lane.b32.xlu1 %v1826_v33, %s1312_s20 }
 0x29f   : > { %857 = vrot.lane.b32.xlu0 %v1821_v29, %s1314_s22  ;;  %831 = vrot.lane.b32.xlu1 %v1826_v33, %s1313_s21 }
 0x2a3   : > { %877 = vrot.lane.b32.xlu0 %v1821_v29, %s1315_s23  ;;  %859 = vrot.lane.b32.xlu1 %v1826_v33, %s1314_s22 }
 0x2a7   : > { %897 = vrot.lane.b32.xlu0 %v1821_v29, %s1316_s29  ;;  %879 = vrot.lane.b32.xlu1 %v1826_v33, %s1315_s23 }
 0x2ab   : > { %917 = vrot.lane.b32.xlu0 %v1821_v29, %s1317_s9  ;;  %899 = vrot.lane.b32.xlu1 %v1826_v33, %s1316_s29 }
 0x2af   : > { %773 = vrot.lane.b32.xlu0 %v1857_v47, %s1311_s19  ;;  %919 = vrot.lane.b32.xlu1 %v1826_v33, %s1317_s9 }
 0x2b3   : > { %813 = vrot.lane.b32.xlu0 %v1857_v47, %s1310_s18  ;;  %775 = vrot.lane.b32.xlu1 %v1864_v10, %s1311_s19 }
 0x2b7   : > { %793 = vrot.lane.b32.xlu0 %v1857_v47, %s1312_s20  ;;  %815 = vrot.lane.b32.xlu1 %v1864_v10, %s1310_s18  ;;  %s1246_s18 = scalar_lea.vmem %s1245_s14, 1024 }
 0x2bb   : > { %833 = vrot.lane.b32.xlu0 %v1857_v47, %s1313_s21  ;;  %795 = vrot.lane.b32.xlu1 %v1864_v10, %s1312_s20 }
 0x2bf   : > { %861 = vrot.lane.b32.xlu0 %v1857_v47, %s1314_s22  ;;  %835 = vrot.lane.b32.xlu1 %v1864_v10, %s1313_s21  ;;  %s287_s21 = sand.u32 1, %s1296_s25  }
 0x2c0   : > { %s2058_s17 = scalar_lea.sflag [#allocation4], %s287_s21 }
 0x2c3   : > { %881 = vrot.lane.b32.xlu0 %v1857_v47, %s1315_s23  ;;  %863 = vrot.lane.b32.xlu1 %v1864_v10, %s1314_s22  ;;  %s1120_s22 = sshll.u32 %s287_s21, 5 }
 0x2c7   : > { %901 = vrot.lane.b32.xlu0 %v1857_v47, %s1316_s29  ;;  %883 = vrot.lane.b32.xlu1 %v1864_v10, %s1315_s23  ;;  %s289_s23 = scalar_lea.vmem [#allocation5], %s1120_s22 }
 0x2cb   : > { %921 = vrot.lane.b32.xlu0 %v1857_v47, %s1317_s9  ;;  %903 = vrot.lane.b32.xlu1 %v1864_v10, %s1316_s29  ;;  %s1040_s29 = sshll.u32 %s289_s23, 4  ;;  %s2049_s29 = int_to_ptr.vmem [resolvable:$true] %s1040_s29 }
 0x2cc   : > { %p1247_p11 = scmp.lt.s32.totalorder %s2049_s29, %s1245_s14 }
 0x2cf   : > { %645 = vperm.xlu0 %1208, %v307_v14   ;;  %923 = vrot.lane.b32.xlu1 %v1864_v10, %s1317_s9  ;;  %s1145_s9 = sshll.u32 %s1381_s28, 9  ;;  %s1240_s28 = scalar_lea.vmem %s2049_s29, 512 }
 0x2d0   : > { %s2054_s8 = scalar_lea.hbm %s2106_s7, %s1145_s9  ;;  %p1241_p6 = scmp.ne.s32.totalorder %s2049_s29, %s1240_s28 }
 0x2d1   : > { %p1248_p12 = scmp.lt.s32.totalorder %s1246_s18, %s1240_s28 }
 0x2d2   : > { %p1242_p9 = pnand %p1241_p6, %p1398_p5 }
 0x2d3   : > { %p1249_p13 = por %p1248_p12, %p1247_p11 }
 0x2d4   : > { %p1243_p10 = pneg %p1242_p9 }
 0x2d6   : > { %p1250_p0 = pnand %p1249_p13, %p1243_p10 }
 0x301   : > { %v770_v28 = vpop.permute.xlu0 %769 }
 0x305   : > { %v810_v6 = vpop.permute.xlu0 %809  ;;  %v772_v23 = vpop.permute.xlu1 %771 }
 0x309   : > { %v790_v60 = vpop.permute.xlu0 %789  ;;  %v812_v63 = vpop.permute.xlu1 %811 }
 0x30d   : > { %v830_v27 = vpop.permute.xlu0 %829  ;;  %v792_v12 = vpop.permute.xlu1 %791 }
 0x311   : > { %v858_v3 = vpop.permute.xlu0 %857  ;;  %v832_v43 = vpop.permute.xlu1 %831 }
 0x315   : > { %v1903_v31 = vpop.permute.xlu0 %877  ;;  %v1905_v45 = vpop.permute.xlu1 %859 }
 0x319   : > { %v1907_v36 = vpop.permute.xlu0 %897  ;;  %v1909_v26 = vpop.permute.xlu1 %879 }
 0x31d   : > { %v1911_v50 = vpop.permute.xlu0 %917  ;;  %v1913_v34 = vpop.permute.xlu1 %899 }
 0x321   : > { %v774_v42 = vpop.permute.xlu0 %773  ;;  %v1915_v24 = vpop.permute.xlu1 %919 }
 0x322   : > { %v777_v40 = vsel %vm415_vm3, %v770_v28, %v774_v42  ;;  %v779_v32 = vsel %vm415_vm3, %v774_v42, %v770_v28 }
 0x323   : > { %v785_v28 = vmul.f32 %v779_v32, %v1581_v58  ;;  %v786_v42 = vmul.f32 %v777_v40, %v1583_v59 }
 0x325   : > { %v814_v17 = vpop.permute.xlu0 %813  ;;  %v776_v13 = vpop.permute.xlu1 %775 }
 0x326   : > { %v817_v37 = vsel %vm458_vm2, %v810_v6, %v814_v17  ;;  %v819_v18 = vsel %vm458_vm2, %v814_v17, %v810_v6  ;;  %v778_v2 = vsel %vm415_vm3, %v772_v23, %v776_v13  ;;  %v780_v6 = vsel %vm415_vm3, %v776_v13, %v772_v23 }
 0x327   : > { %v825_v14 = vmul.f32 %v819_v18, %v1569_v52  ;;  %v826_v11 = vmul.f32 %v817_v37, %v1571_v53  ;;  %v787_v52 = vmul.f32 %v780_v6, %v1616_v15  ;;  %v788_v53 = vmul.f32 %v778_v2, %v1618_v16 }
 0x328   : > { %v854_v23 = vmul.f32 %v1857_v47, %v1577_v56  ;;  %v856_v56 = vmul.f32 %v1864_v10, %v1636_v30 }
 0x329   : > { %v794_v20 = vpop.permute.xlu0 %793  ;;  %v816_v8 = vpop.permute.xlu1 %815  ;;  %v937_v13 = vadd.f32 %v825_v14, %v785_v28  ;;  %v938_v37 = vadd.f32 %v826_v11, %v786_v42  ;;  %v2145_v14 = vld [vmem:[#allocation8_spill] sm:$0xff]  ;;  %v2146_v11 = vld [vmem:[#allocation9_spill] sm:$0xff] }
 0x32a   : > { %v818_v38 = vsel %vm458_vm2, %v812_v63, %v816_v8  ;;  %v820_v62 = vsel %vm458_vm2, %v816_v8, %v812_v63  ;;  %v853_v8 = vmul.f32 %v1821_v29, %v1567_v51  ;;  %v797_v15 = vsel %vm436_vm5, %v790_v60, %v794_v20  ;;  %v2147_v42 = vld [vmem:[#allocation13_spill] sm:$0xff] }
 0x32b   : > { %v827_v1 = vmul.f32 %v820_v62, %v1598_v4  ;;  %v828_v63 = vmul.f32 %v818_v38, %v1600_v5  ;;  %v799_v16 = vsel %vm436_vm5, %v794_v20, %v790_v60  ;;  %v855_v51 = vmul.f32 %v1826_v33, %v1579_v57 }
 0x32c   : > { %v805_v30 = vmul.f32 %v799_v16, %v1638_v41  ;;  %v806_v33 = vmul.f32 %v797_v15, %v1640_v44  ;;  %v941_v10 = vadd.f32 %v937_v13, %v853_v8  ;;  %v942_v20 = vadd.f32 %v938_v37, %v854_v23  ;;  %v2150_v16 = vld [vmem:[#allocation12_spill] sm:$0xff] }
 0x32d   : > { %v834_v17 = vpop.permute.xlu0 %833  ;;  %v796_v55 = vpop.permute.xlu1 %795  ;;  %v939_v29 = vadd.f32 %v827_v1, %v787_v52  ;;  %v940_v47 = vadd.f32 %v828_v63, %v788_v53  ;;  %v2148_v52 = vld [vmem:[#allocation14_spill] sm:$0xff] }
 0x32e   : > { %v837_v58 = vsel %vm480_vm4, %v830_v27, %v834_v17  ;;  %v839_v59 = vsel %vm480_vm4, %v834_v17, %v830_v27  ;;  %v798_v18 = vsel %vm436_vm5, %v792_v12, %v796_v55  ;;  %v800_v27 = vsel %vm436_vm5, %v796_v55, %v792_v12  ;;  %v2144_v12 = vld [vmem:[#allocation10_spill] sm:$0xff] }
 0x32f   : > { %v845_v40 = vmul.f32 %v839_v59, %v1624_v21  ;;  %v846_v32 = vmul.f32 %v837_v58, %v1626_v19  ;;  %v807_v55 = vmul.f32 %v800_v27, %v1669_v49  ;;  %v808_v21 = vmul.f32 %v798_v18, %v2144_v12  ;;  %v2152_v18 = vld [vmem:[#allocation19_spill] sm:$0xff]  ;;  %v2153_v27 = vld [vmem:[#allocation20_spill] sm:$0xff] }
 0x330   : > { %v943_v2 = vadd.f32 %v939_v29, %v855_v51  ;;  %v944_v44 = vadd.f32 %v940_v47, %v856_v56  ;;  %v2151_v29 = vld [vmem:[#allocation21_spill] sm:$0xff] }
 0x331   : > { %v862_v4 = vpop.permute.xlu0 %861  ;;  %v836_v5 = vpop.permute.xlu1 %835  ;;  %v953_v6 = vadd.f32 %v845_v40, %v805_v30  ;;  %v954_v17 = vadd.f32 %v846_v32, %v806_v33  ;;  %v2155_v33 = vld [vmem:[#allocation18_spill] sm:$0xff] }
 0x332   : > { %v865_v60 = vsel %vm511_vm6, %v858_v3, %v862_v4  ;;  %v867_v57 = vsel %vm511_vm6, %v862_v4, %v858_v3  ;;  %v838_v19 = vsel %vm480_vm4, %v832_v43, %v836_v5  ;;  %v840_v62 = vsel %vm480_vm4, %v836_v5, %v832_v43  ;;  %v2149_v5 = vld [vmem:[#allocation11_spill] sm:$0xff] }
 0x333   : > { %v873_v3 = vmul.f32 %v865_v60, %v2145_v14  ;;  %v874_v41 = vmul.f32 %v867_v57, %v2146_v11  ;;  %v847_v63 = vmul.f32 %v840_v62, %v2147_v42  ;;  %v848_v43 = vmul.f32 %v838_v19, %v2148_v52  ;;  %v2154_v57 = vld [vmem:[#allocation17_spill] sm:$0xff]  ;;  %v2156_v14 = vld [vmem:[#allocation15_spill] sm:$0xff]  ;;  %v2157_v11 = vld [vmem:[#allocation16_spill] sm:$0xff] }
 0x335   : > { %v882_v1 = vpop.permute.xlu0 %881  ;;  %v864_v38 = vpop.permute.xlu1 %863  ;;  %v957_v4 = vadd.f32 %v953_v6, %v873_v3  ;;  %v955_v32 = vadd.f32 %v847_v63, %v807_v55  ;;  %v956_v60 = vadd.f32 %v848_v43, %v808_v21 }
 0x336   : > { %v885_v49 = vsel %vm533_vm7, %v1903_v31, %v882_v1  ;;  %v887_v28 = vsel %vm533_vm7, %v882_v1, %v1903_v31  ;;  %v866_v53 = vsel %vm511_vm6, %v1905_v45, %v864_v38  ;;  %v868_v8 = vsel %vm511_vm6, %v864_v38, %v1905_v45 }
 0x337   : > { %v958_v45 = vadd.f32 %v954_v17, %v874_v41  ;;  %v893_v15 = vmul.f32 %v885_v49, %v2149_v5  ;;  %v894_v51 = vmul.f32 %v887_v28, %v2150_v16  ;;  %v875_v56 = vmul.f32 %v866_v53, %v1744_v61 }
 0x338   : > { %v876_v47 = vmul.f32 %v868_v8, %v2151_v29 }
 0x339   : > { %v902_v23 = vpop.permute.xlu0 %901  ;;  %v884_v13 = vpop.permute.xlu1 %883  ;;  %v945_v21 = vadd.f32 %v941_v10, %v893_v15  ;;  %v946_v62 = vadd.f32 %v942_v20, %v894_v51  ;;  %v959_v6 = vadd.f32 %v955_v32, %v875_v56 }
 0x33a   : > { %v905_v37 = vsel %vm555_vm8, %v1907_v36, %v902_v23  ;;  %v907_v31 = vsel %vm555_vm8, %v902_v23, %v1907_v36  ;;  %v886_v58 = vsel %vm533_vm7, %v1909_v26, %v884_v13  ;;  %v888_v59 = vsel %vm533_vm7, %v884_v13, %v1909_v26 }
 0x33b   : > { %v913_v36 = vmul.f32 %v905_v37, %v2152_v18  ;;  %v914_v40 = vmul.f32 %v907_v31, %v2153_v27  ;;  %v895_v30 = vmul.f32 %v886_v58, %v2154_v57  ;;  %v896_v26 = vmul.f32 %v888_v59, %v2155_v33 }
 0x33c   : > { %v960_v17 = vadd.f32 %v956_v60, %v876_v47 }
 0x33d   : > { %v922_v1 = vpop.permute.xlu0 %921  ;;  %v904_v38 = vpop.permute.xlu1 %903  ;;  %v961_v49 = vadd.f32 %v957_v4, %v913_v36  ;;  %v962_v28 = vadd.f32 %v958_v45, %v914_v40  ;;  %v947_v53 = vadd.f32 %v943_v2, %v895_v30 }
 0x33e   : > { %v925_v12 = vsel %vm577_vm9, %v1911_v50, %v922_v1  ;;  %v927_v61 = vsel %vm577_vm9, %v922_v1, %v1911_v50  ;;  %v906_v19 = vsel %vm555_vm8, %v1913_v34, %v904_v38  ;;  %v908_v55 = vsel %vm555_vm8, %v904_v38, %v1913_v34  ;;  %v754_v36 = vpop.f32.mrf.mxu1 }
 0x33f   : > { %v933_v3 = vmul.f32 %v925_v12, %v2156_v14  ;;  %v934_v41 = vmul.f32 %v927_v61, %v2157_v11  ;;  %v915_v63 = vmul.f32 %v906_v19, %v1772_v0  ;;  %v916_v52 = vmul.f32 %v908_v55, %v1774_v39 }
 0x340   : > { %v948_v34 = vadd.f32 %v944_v44, %v896_v26 }
 0x341   : > { %v949_v42 = vadd.f32 %v945_v21, %v933_v3  ;;  %v950_v50 = vadd.f32 %v946_v62, %v934_v41  ;;  %v924_v43 = vpop.permute.xlu1 %923  ;;  %v963_v37 = vadd.f32 %v959_v6, %v915_v63  ;;  %v964_v39 = vadd.f32 %v960_v17, %v916_v52 }
 0x342   : > { %v926_v10 = vsel %vm577_vm9, %v1915_v24, %v924_v43  ;;  %v928_v20 = vsel %vm577_vm9, %v924_v43, %v1915_v24 }
 0x343   : > { %v965_v8 = vadd.f32 %v961_v49, %v949_v42  ;;  %v966_v23 = vadd.f32 %v962_v28, %v950_v50  ;;  %v935_v13 = vmul.f32 %v926_v10, %v1758_v35  ;;  %v936_v0 = vmul.f32 %v928_v20, %v1760_v46 }
 0x345   : > { %v951_v31 = vadd.f32 %v947_v53, %v935_v13  ;;  %v952_v2 = vadd.f32 %v948_v34, %v936_v0  ;;  %v969_v44 = vadd.f32 %v965_v8, %v1788_v54  ;;  %v970_v58 = vadd.f32 %v966_v23, %v1788_v54  ;;  %v2158_v54 = vld [vmem:[#allocation23_spill] sm:$0xff] }
 0x347   : > { %v967_v59 = vadd.f32 %v963_v37, %v951_v31  ;;  %v968_v4 = vadd.f32 %v964_v39, %v952_v2  ;;  %v973_v35 = vmax.f32 %v969_v44, 0.0  ;;  %v974_v46 = vmax.f32 %v970_v58, 0.0 }
 0x349   : > { %v971_v48 = vadd.f32 %v967_v59, %v1793_v7  ;;  %v972_v24 = vadd.f32 %v968_v4, %v1793_v7  ;;  %v2159_v7 = vld [vmem:[#allocation22_spill] sm:$0xff] }
 0x34a   : > { %v646_v45 = vpop.permute.xlu0 %645 }
 0x34b   : > { %v975_v5 = vmax.f32 %v971_v48, 0.0  ;;  %v687_v15 = vadd.f32 %v1816_v25, %v646_v45  ;;  %v689_v16 = vadd.f32 %v1818_v22, %v646_v45  ;;  %v976_v51 = vmax.f32 %v972_v24, 0.0  ;;  %v756_v25 = vpop.f32.mrf.mxu1 }
 0x34d   : > { %v693_v56 = vadd.f32 %v687_v15, %v1894_v9  ;;  %v694_v29 = vadd.f32 %v689_v16, %v2158_v54  ;;  %v978_v47 = vpack.c.bf16 %v976_v51, %v974_v46  ;;  %v977_v18 = vpack.c.bf16 %v975_v5, %v973_v35  ;;  %v758_v27 = vpop.f32.mrf.mxu1 }
 0x34f   : > { %695 = vst [vmem:[%s289_s23] sm:$0xff] %v693_v56  ;;  %696 = vst [vmem:[%s289_s23 + $0x8] sm:$0xff] %v694_v29  ;;  %993 = vmatprep.subr.bf16.mxu0 %v978_v47  ;;  %v759_v22 = vpop.f32.mrf.mxu1 }
 0x350   : > { %994 = vmatpush1.bf16.msra.mxu0 %v977_v18 }
 0x353   : > { %1134 = vmatmul.mubr.msk.bf16.vlgmr.msra.gmra.mxu0 %vm648_vm10, %v2159_v7 }
 0x413   : > { %v1013_v40 = vpop.f32.mrf.mxu0 }
 0x414   : > { %v1014_v9 = vadd.f32 %v1013_v40, %v646_v45 }
 0x415   : > { %v1015_v32 = vpop.f32.mrf.mxu0 }
 0x416   : > { %v1020_v60 = vadd.f32 %v1014_v9, %v754_v36  ;;  %v1016_v57 = vadd.f32 %v1015_v32, %v646_v45 }
 0x417   : > { %v1017_v30 = vpop.f32.mrf.mxu0 }
 0x418   : > { %1135 = vst [vmem:[%s289_s23 + $0x10] sm:$0xff] %v1020_v60  ;;  %v1021_v33 = vadd.f32 %v1016_v57, %v756_v25 }
 0x419   : > { %v1018_v26 = vpop.f32.mrf.mxu0 }
 0x41a   : > { %1136 = vst [vmem:[%s289_s23 + $0x18] sm:$0xff] %v1021_v33 }
 0x41b   : > { %1253 = shalt.err (!%p1250_p0)
}
 0x41c   : > { %s1254_s19 = scalar_lea.hbm %s2054_s8, 512  ;;  %s1258_s23 = scalar_lea.hbm %s2106_s7, 1024 }
 0x41d   : > { %p1255_p1 = scmp.ne.s32.totalorder %s2054_s8, %s1254_s19  ;;  %p1259_p4 = scmp.lt.s32.totalorder %s2054_s8, %s2106_s7 }
 0x41e   : > { %p1260_p7 = scmp.lt.s32.totalorder %s1258_s23, %s1254_s19 }
 0x41f   : > { %p1256_p2 = pnand %p1255_p1, %p1398_p5 }
 0x420   : > { %p1261_p8 = por %p1260_p7, %p1259_p4 }
 0x421   : > { %p1257_p3 = pneg %p1256_p2 }
 0x423   : > { %p1262_p6 = pnand %p1261_p8, %p1257_p3 }
 0x425   : > { %1265 = shalt.err (!%p1262_p6)
}
 0x426   : > { %s1319_s16 = smov 256  }
 0x427   : > { %1150 = dma.vmem_to_hbm [thread:$0]  (%p1398_p5), %s2049_s29, 512, %s2054_s8, %s2058_s17, %s1319_s16, %s1319_s16, %s1312_s20  }
 0x428 PF: > { %p1162_p9 = scmp.ge.s32.totalorder %s1304_s27, 2  ;;  %s1055_s28 = sand.u32 1, %s1292_s24  }
 0x429   : > { %p2160_p10 = scmp.ne.s32.totalorder %s2125_s12, 0  ;;  %s1056_s13 = scalar_lea.sflag [#allocation4], %s1055_s28 }
 0x42b   : > { %p1157_p11 = pnand %p1162_p9, %p2160_p10 }
 0x42d   : > { %p1158_p12 = pneg %p1157_p11 }
 0x42f   : > { %1287 = dma.done.wait (%p1158_p12), %s1056_s13, 512  }
 0x430   : > { %1289 = vsyncadd (%p1158_p12), %s1056_s13, 4294966784  ;;  %p18_p13 = scmp.ge.s32.totalorder %s1385_s30, 4   ;;  %s2161_s24 = smov %s1296_s25 }
 0x431   : > { %s2162_s25 = smov %s1300_s26  ;;  %s2163_s26 = smov %s1396_s10 }
 0x432   : > { %s2164_s27 = smov %s1385_s30  ;;  %20 = sbr.rel (!%p18_p13) target bundleno = 4 (0x4), region = 98 }
 0x437   :  { %1061 = vsyncpa [#allocation3], 1 }
 0x438   :  { %1063 = vsyncpa [#allocation3 + $0x1], 1 }
 0x439   :  { %1064 = vsyncpa [#allocation4], 1 }
 0x43a   :  { %1066 = vsyncpa [#allocation4 + $0x1], 1 }

</bundles_post_ra>
